<compile_context>
chip_gen: v7x
topology: tpu7x:2x2x1
jax: 0.10.0
libtpu: 0.0.40
codegen_flags: <defaults>
</compile_context>

<pallas_src>
import math

import numpy as np
import jax
import jax.numpy as jnp
from jax.experimental import pallas as pl
from jax.experimental.pallas import tpu as pltpu


_VMEM_LIMIT = 32 * 1024 * 1024   # <= scoped/physical VMEM on v5e, v6e and v7x


def _round_up(x, m):
    return ((x + m - 1) // m) * m


# ----------------------------- Pallas kernels -----------------------------

def _mm_kernel(x_ref, y_ref, o_ref):
    """out = X @ Y.  f32 accumulation directly into the K-resident output tile."""
    k = pl.program_id(2)

    @pl.when(k == 0)
    def _init():
        o_ref[...] = jnp.zeros_like(o_ref)

    o_ref[...] += jnp.dot(x_ref[...], y_ref[...],
                          preferred_element_type=jnp.float32)


def _mm_bias_kernel(x_ref, y_ref, b_ref, o_ref):
    """out = X @ Y + bias.  Bias folded into the K==0 init (no epilogue copy)."""
    k = pl.program_id(2)

    @pl.when(k == 0)
    def _init():
        o_ref[...] = jnp.broadcast_to(b_ref[...], o_ref.shape).astype(o_ref.dtype)

    o_ref[...] += jnp.dot(x_ref[...], y_ref[...],
                          preferred_element_type=jnp.float32)


def _bsmm_bias_kernel(kidx_ref, cnt_ref, a_ref, y_ref, b_ref, o_ref):
    """Block-sparse  out = A @ Y + bias.

    Grid axis 2 walks a compacted, scalar-prefetched list of nonzero K-block
    indices of A for the current row block.  Beyond cnt[i] the padded index
    repeats the previous block (pipeline elides the DMA) and pl.when skips the
    compute, so all-zero (tm, tk) tiles of A cost nothing.
    """
    i = pl.program_id(0)
    t = pl.program_id(2)

    @pl.when(t == 0)
    def _init():
        o_ref[...] = jnp.broadcast_to(b_ref[...], o_ref.shape).astype(o_ref.dtype)

    @pl.when(t < cnt_ref[i])
    def _acc():
        o_ref[...] += jnp.dot(a_ref[...], y_ref[...],
                              preferred_element_type=jnp.float32)


def _fused_ahw_bias_kernel(a_ref, h_ref, w_ref, b_ref, o_ref, acc_ref):
    """Fused  out = (A @ H) @ W + bias  (re-associated; A@H never touches HBM)."""
    k = pl.program_id(1)

    @pl.when(k == 0)
    def _init():
        acc_ref[...] = jnp.zeros_like(acc_ref)

    acc_ref[...] += jnp.dot(a_ref[...], h_ref[...],
                            preferred_element_type=jnp.float32)

    @pl.when(k == pl.num_programs(1) - 1)
    def _fin():
        # TODO(synk): the bf16 re-cast of the AH accumulator loses ~3 digits; for very
        #             large graphs keep this epilogue matmul in f32 (slower multi-pass).
        ahw = jnp.dot(acc_ref[...].astype(jnp.bfloat16), w_ref[...],
                      preferred_element_type=jnp.float32)
        o_ref[...] = (ahw + b_ref[...]).astype(o_ref.dtype)


# ------------------------------ Pallas wrappers ----------------------------

def matmul_pallas(x, y, bias=None, *, tm=512, tn=512, tk=512):
    """out = x @ y (+ bias), tiled on the MXU, f32 output accumulated in place.

    Operands should already be in an MXU-native dtype (bf16); cast once in HBM by
    the caller, never per tile in-kernel.
    """
    M, K = x.shape
    K2, N = y.shape
    assert K == K2
    tm = min(tm, _round_up(M, 8))
    tn = min(tn, _round_up(N, 128))
    tk = min(tk, _round_up(K, 128))
    Mp, Kp, Np = _round_up(M, tm), _round_up(K, tk), _round_up(N, tn)

    if (Mp, Kp) != (M, K):
        x = jnp.pad(x, ((0, Mp - M), (0, Kp - K)))
    if (Kp, Np) != (K, N):
        y = jnp.pad(y, ((0, Kp - K), (0, Np - N)))

    grid = (Mp // tm, Np // tn, Kp // tk)
    x_spec = pl.BlockSpec((tm, tk), lambda i, j, k: (i, k))
    y_spec = pl.BlockSpec((tk, tn), lambda i, j, k: (k, j))
    out_spec = pl.BlockSpec((tm, tn), lambda i, j, k: (i, j))
    params = pltpu.CompilerParams(
        dimension_semantics=("parallel", "parallel", "arbitrary"),
        vmem_limit_bytes=_VMEM_LIMIT)

    if bias is None:
        out = pl.pallas_call(
            _mm_kernel,
            out_shape=jax.ShapeDtypeStruct((Mp, Np), jnp.float32),
            grid_spec=pltpu.PrefetchScalarGridSpec(
                num_scalar_prefetch=0, grid=grid,
                in_specs=[x_spec, y_spec], out_specs=out_spec),
            compiler_params=params,
        )(x, y)
    else:
        bias2d = bias.reshape(1, -1).astype(jnp.float32)
        if bias2d.shape[1] != Np:
            bias2d = jnp.pad(bias2d, ((0, 0), (0, Np - bias2d.shape[1])))
        out = pl.pallas_call(
            _mm_bias_kernel,
            out_shape=jax.ShapeDtypeStruct((Mp, Np), jnp.float32),
            grid_spec=pltpu.PrefetchScalarGridSpec(
                num_scalar_prefetch=0, grid=grid,
                in_specs=[x_spec, y_spec,
                          pl.BlockSpec((1, tn), lambda i, j, k: (0, j))],
                out_specs=out_spec),
            compiler_params=params,
        )(x, y, bias2d)
    return out[:M, :N]


def sparse_graph_matmul_bias(A_np, y, bias, *, tm=512, tn=512, tk=512):
    """out = A @ y + bias, with A a host-side (n, n) numpy graph matrix.

    Block-sparse: the per-row-block list of nonzero (tm, tk) tiles of A is
    computed on host, scalar-prefetched into SMEM and used by data-dependent
    index_maps, so zero tiles are neither streamed from HBM nor multiplied.
    """
    M, K = A_np.shape
    K2, N = y.shape
    assert K == K2
    tm = min(tm, _round_up(M, 8))
    tn = min(tn, _round_up(N, 128))
    tk = min(tk, _round_up(K, 128))
    Mp, Kp, Np = _round_up(M, tm), _round_up(K, tk), _round_up(N, tn)
    nib, nkb = Mp // tm, Kp // tk

    # host-side block mask + compacted nonzero K-block indices per row block
    A_pad = np.zeros((Mp, Kp), dtype=np.float32)
    A_pad[:M, :K] = A_np
    blk_nz = np.abs(A_pad).reshape(nib, tm, nkb, tk).sum(axis=(1, 3)) > 0.0
    counts = blk_nz.sum(axis=1).astype(np.int32)
    max_nnz = max(1, int(counts.max()))
    kidx = np.zeros((nib, max_nnz), dtype=np.int32)
    for i in range(nib):
        nz = np.nonzero(blk_nz[i])[0].astype(np.int32)
        if nz.size:
            kidx[i, :nz.size] = nz
            kidx[i, nz.size:] = nz[-1]     # repeat last index -> pipeline elides the DMA
    kidx_flat = jnp.asarray(kidx.reshape(-1))   # 1-D SMEM (avoids (8,128) 2-D padding)
    cnt = jnp.asarray(counts)

    A_dev = jnp.asarray(A_pad, dtype=jnp.bfloat16)   # bf16: halves the n^2 HBM stream
    # TODO(synk): quantize A further (fp8 on v7x, int8 on v5e/v6e) with the scale folded
    #             into the bias init; the kernel is HBM-bound at small out_features.
    if (Kp, Np) != (K, N):
        y = jnp.pad(y, ((0, Kp - K), (0, Np - N)))
    bias2d = bias.reshape(1, -1).astype(jnp.float32)
    if bias2d.shape[1] != Np:
        bias2d = jnp.pad(bias2d, ((0, 0), (0, Np - bias2d.shape[1])))

    def a_map(i, j, t, kidx_ref, cnt_ref):
        return (i, kidx_ref[i * max_nnz + t])

    def y_map(i, j, t, kidx_ref, cnt_ref):
        return (kidx_ref[i * max_nnz + t], j)

    grid = (nib, Np // tn, max_nnz)
    out = pl.pallas_call(
        _bsmm_bias_kernel,
        out_shape=jax.ShapeDtypeStruct((Mp, Np), jnp.float32),
        grid_spec=pltpu.PrefetchScalarGridSpec(
            num_scalar_prefetch=2,
            grid=grid,
            in_specs=[
                pl.BlockSpec((tm, tk), a_map),
                pl.BlockSpec((tk, tn), y_map),
                pl.BlockSpec((1, tn), lambda i, j, t, kidx_ref, cnt_ref: (0, j)),
            ],
            out_specs=pl.BlockSpec((tm, tn),
                                   lambda i, j, t, kidx_ref, cnt_ref: (i, j)),
        ),
        compiler_params=pltpu.CompilerParams(
            dimension_semantics=("parallel", "parallel", "arbitrary"),
            vmem_limit_bytes=_VMEM_LIMIT),
    )(kidx_flat, cnt, A_dev, y, bias2d)
    return out[:M, :N]


def fused_graphconv_pallas(A, Hp, Wp, bias_pad, *, tm=512, tk=512):
    """out = (A @ Hp) @ Wp + bias, one pallas_call (A@H never round-trips HBM).

    A, Hp, Wp expected in bf16; Wp stays VMEM-resident so the caller must keep
    a_pad * b_pad * 2 bytes well under the scoped VMEM limit.
    """
    M, K = A.shape
    K2, a_pad = Hp.shape
    a_pad2, b_pad = Wp.shape
    assert K == K2 and a_pad == a_pad2
    tm = min(tm, _round_up(M, 8))
    tk = min(tk, _round_up(K, 128))
    Mp, Kp = _round_up(M, tm), _round_up(K, tk)
    if (Mp, Kp) != (M, K):
        A = jnp.pad(A, ((0, Mp - M), (0, Kp - K)))
    if Kp != K:
        Hp = jnp.pad(Hp, ((0, Kp - K), (0, 0)))
    bias2d = bias_pad.reshape(1, -1).astype(jnp.float32)

    grid = (Mp // tm, Kp // tk)
    out = pl.pallas_call(
        _fused_ahw_bias_kernel,
        out_shape=jax.ShapeDtypeStruct((Mp, b_pad), jnp.float32),
        grid_spec=pltpu.PrefetchScalarGridSpec(
            num_scalar_prefetch=0,
            grid=grid,
            in_specs=[
                pl.BlockSpec((tm, tk), lambda i, k: (i, k)),         # A tile
                pl.BlockSpec((tk, a_pad), lambda i, k: (k, 0)),      # H tile
                pl.BlockSpec((a_pad, b_pad), lambda i, k: (0, 0)),   # W (resident, bf16)
                pl.BlockSpec((1, b_pad), lambda i, k: (0, 0)),       # bias
            ],
            out_specs=pl.BlockSpec((tm, b_pad), lambda i, k: (i, 0)),
            scratch_shapes=[pltpu.VMEM((tm, a_pad), jnp.float32)],
        ),
        compiler_params=pltpu.CompilerParams(
            dimension_semantics=("parallel", "arbitrary"),
            vmem_limit_bytes=_VMEM_LIMIT),
    )(A, Hp, Wp, bias2d)
    return out[:M]


# --------------------- host-side hypergraph approximation ------------------
# Faithful dense-numpy re-implementation of update/adjacency/symnormalise/laplacian.

def _update(Se, Ie, mediator, weights, c):
    for (x, y) in [(Se, mediator), (Ie, mediator), (mediator, Se), (mediator, Ie)]:
        weights[(x, y)] = weights.get((x, y), 0.0) + float(1.0 / c)
    return weights


def laplacian_dense(V, E, X, m, rng):
    """Dense (V, V) float32 normalized adjacency D^-1/2 (adj + I) D^-1/2."""
    edges, weights = [], {}
    rv = rng.rand(X.shape[1])
    for k in E.keys():
        hyperedge = list(E[k])
        p = np.dot(X[hyperedge], rv)
        s, i = np.argmax(p), np.argmin(p)
        Se, Ie = hyperedge[s], hyperedge[i]
        c = 2 * len(hyperedge) - 3
        if m:
            edges.extend([[Se, Ie], [Ie, Se]])
            weights[(Se, Ie)] = weights.get((Se, Ie), 0.0) + float(1.0 / c)
            weights[(Ie, Se)] = weights.get((Ie, Se), 0.0) + float(1.0 / c)
            for mediator in hyperedge:
                if mediator != Se and mediator != Ie:
                    edges.extend([[Se, mediator], [Ie, mediator],
                                  [mediator, Se], [mediator, Ie]])
                    weights = _update(Se, Ie, mediator, weights, c)
        else:
            edges.extend([[Se, Ie], [Ie, Se]])
            e = len(hyperedge)
            weights[(Se, Ie)] = weights.get((Se, Ie), 0.0) + float(1.0 / e)
            weights[(Ie, Se)] = weights.get((Ie, Se), 0.0) + float(1.0 / e)

    dedup = {tuple(item): idx for idx, item in enumerate(edges)}
    adj = np.zeros((V, V), dtype=np.float32)
    for (i, j) in dedup.keys():
        adj[i, j] = weights[(i, j)]
    adj = adj + np.eye(V, dtype=np.float32)

    d = adj.sum(axis=1)
    with np.errstate(divide="ignore"):
        dhi = np.power(d, -0.5)
    dhi[np.isinf(dhi)] = 0.0
    A = (dhi[:, None] * adj) * dhi[None, :]
    return A.astype(np.float32)


# ------------------------------- the module --------------------------------

class HyperGraphConvolutionPallas:
    def __init__(self, a, b, reapproximate=True, key=None):
        if key is None:
            key = jax.random.PRNGKey(0)
        self.a, self.b = a, b
        self.reapproximate = reapproximate
        std = 1.0 / math.sqrt(b)
        kW, kb = jax.random.split(key)
        # deterministic uniform(-std, std) init, matching reset_parameters()
        self.W = jax.random.uniform(kW, (a, b), jnp.float32, -std, std)
        self.bias = jax.random.uniform(kb, (b,), jnp.float32, -std, std)
        # lane-dense padded bf16 parameter copies (created once; avoids per-tile casts)
        self.a_pad = _round_up(a, 128)
        self.b_pad = _round_up(b, 128)
        self.W_pad_bf16 = (jnp.zeros((self.a_pad, self.b_pad), jnp.float32)
                           .at[:a, :b].set(self.W).astype(jnp.bfloat16))
        self.bias_pad = jnp.zeros((self.b_pad,), jnp.float32).at[:b].set(self.bias)
        self.last_A = None   # host graph approximation kept for tests/inspection

    def _pad_H_bf16(self, H):
        Hp = H.astype(jnp.float32)
        if self.a_pad != self.a:
            Hp = jnp.pad(Hp, ((0, 0), (0, self.a_pad - self.a)))
        return Hp.astype(jnp.bfloat16)   # one HBM-level cast, not per tile

    def __call__(self, structure, H, m=True):
        n = H.shape[0]
        Hp = self._pad_H_bf16(H)

        if self.reapproximate:
            # HW = H @ W  (bf16 MXU inputs, f32 accumulated straight into the output)
            HWp = matmul_pallas(Hp, self.W_pad_bf16)                    # (n, b_pad) f32
            # host-side hypergraph -> graph approximation (module semantics: .cpu().numpy())
            # TODO(synk): cache A across calls when the approximation need not be refreshed.
            X = np.asarray(jax.device_get(HWp[:, :self.b]))
            A_np = laplacian_dense(n, structure, X, m, np.random.RandomState(0))
            self.last_A = A_np
            # out = A @ HW + bias: block-sparse A (zero tiles skipped), bf16 operands
            out = sparse_graph_matmul_bias(A_np, HWp.astype(jnp.bfloat16),
                                           self.bias_pad)
        else:
            A = jnp.asarray(structure, dtype=jnp.bfloat16)   # dense adjacency supplied
            if self.a_pad * self.b_pad * 2 <= 8 * 1024 * 1024:
                # bf16 W fits comfortably resident in VMEM -> single fused kernel
                out = fused_graphconv_pallas(A, Hp, self.W_pad_bf16, self.bias_pad)
            else:
                HWp = matmul_pallas(Hp, self.W_pad_bf16)
                out = matmul_pallas(A, HWp.astype(jnp.bfloat16), self.bias_pad)

        return out[:, :self.b]   # slice padded columns off: (n, out_features)


# --------------------------------- main -------------------------------------

if __name__ == "__main__":
    key = jax.random.PRNGKey(0)
    k_feat, k_param = jax.random.split(key)

    n_nodes, in_feat, out_feat = 16, 8, 32
    H = jax.random.normal(k_feat, (n_nodes, in_feat), jnp.float32)

    # small deterministic hypergraph: dict of hyperedges -> list of vertices
    structure = {
        0: [0, 1, 2, 3],
        1: [2, 4, 5],
        2: [5, 6, 7, 8, 9],
        3: [9, 10, 11],
        4: [11, 12, 13, 14, 15],
        5: [0, 15, 7],
    }

    H_np = np.asarray(H)

    # ---- path 1: reapproximate=True (host laplacian between the two matmuls) ----
    layer = HyperGraphConvolutionPallas(in_feat, out_feat,
                                        reapproximate=True, key=k_param)
    out = jax.block_until_ready(layer(structure, H, m=True))
    assert out.shape == (n_nodes, out_feat)

    W_np = np.asarray(layer.W)
    b_np = np.asarray(layer.bias)
    HW_ref = H_np @ W_np
    # Use the A the layer actually built (the bf16 H@W feeds the host argmax/argmin, so
    # near-ties could otherwise pick a different Se/Ie than a pure-f32 reference).
    A_used = layer.last_A
    ref = A_used @ HW_ref + b_np[None, :]
    # bf16 MXU inputs with f32 accumulation -> loosened tolerance vs the f32 reference
    np.testing.assert_allclose(np.asarray(out), ref, rtol=2e-2, atol=2e-2)

    # ---- path 2: reapproximate=False (fused (A @ H) @ W + bias kernel) ----
    A_ref = laplacian_dense(n_nodes, structure, HW_ref, True, np.random.RandomState(0))
    layer2 = HyperGraphConvolutionPallas(in_feat, out_feat,
                                         reapproximate=False, key=k_param)
    out2 = jax.block_until_ready(layer2(jnp.asarray(A_ref), H, m=True))
    assert out2.shape == (n_nodes, out_feat)
    ref2 = A_ref @ HW_ref + b_np[None, :]
    np.testing.assert_allclose(np.asarray(out2), ref2, rtol=2e-2, atol=2e-2)

    print("KERNEL_OK")
</pallas_src>

<mosaic_0001>
module attributes {stable_mosaic.version = 11 : i64} {
  func.func @_mm_kernel(%arg0: i32, %arg1: i32, %arg2: i32, %arg3: memref<16x128xbf16, #tpu.memory_space<vmem>>, %arg4: memref<128x128xbf16, #tpu.memory_space<vmem>>, %arg5: memref<16x128xf32, #tpu.memory_space<vmem>>) attributes {dimension_semantics = [#tpu.dimension_semantics<parallel>, #tpu.dimension_semantics<parallel>, #tpu.dimension_semantics<arbitrary>], iteration_bounds = array<i64: 1, 1, 1>, scalar_prefetch = 0 : i64, scratch_operands = 0 : i64, tpu.core_type = #tpu.core_type<tc>, window_params = [{transform_indices = @transform_0, window_bounds = array<i64: 16, 128>}, {transform_indices = @transform_1, window_bounds = array<i64: 128, 128>}, {transform_indices = @transform_2, window_bounds = array<i64: 16, 128>}]} {
    %c0_i32 = arith.constant 0 : i32
    %0 = arith.cmpi eq, %arg2, %c0_i32 : i32
    %1 = arith.extui %0 : i1 to i32
    %c0_i32_0 = arith.constant 0 : i32
    %2 = arith.cmpi ne, %1, %c0_i32_0 : i32
    scf.if %2 {
      %cst_8 = arith.constant 0.000000e+00 : f32
      %9 = vector.broadcast %cst_8 : f32 to vector<16x128xf32>
      %c0_9 = arith.constant 0 : index
      %c0_10 = arith.constant 0 : index
      %10 = vector.load %arg5[%c0_9, %c0_10] : memref<16x128xf32, #tpu.memory_space<vmem>>, vector<16x128xf32>
      tpu.vector_store %arg5[%c0_9, %c0_10], %9 {strides = array<i32>} : memref<16x128xf32, #tpu.memory_space<vmem>>, vector<16x128xf32>,
    } else {
    }
    %c0 = arith.constant 0 : index
    %c0_1 = arith.constant 0 : index
    %3 = vector.load %arg5[%c0, %c0_1] : memref<16x128xf32, #tpu.memory_space<vmem>>, vector<16x128xf32>
    %c0_2 = arith.constant 0 : index
    %c0_3 = arith.constant 0 : index
    %4 = vector.load %arg3[%c0_2, %c0_3] : memref<16x128xbf16, #tpu.memory_space<vmem>>, vector<16x128xbf16>
    %c0_4 = arith.constant 0 : index
    %c0_5 = arith.constant 0 : index
    %5 = vector.load %arg4[%c0_4, %c0_5] : memref<128x128xbf16, #tpu.memory_space<vmem>>, vector<128x128xbf16>
    %cst = arith.constant dense<0.000000e+00> : vector<16x128xf32>
    %6 = tpu.matmul %4, %5, %cst {dimension_numbers = #tpu.dot_dimension_numbers<[1], [0], [0], [1], [0, 0, 1, 1], [], []>} : vector<16x128xbf16>, vector<128x128xbf16>, vector<16x128xf32> -> vector<16x128xf32>
    %7 = arith.addf %3, %6 : vector<16x128xf32>
    %c0_6 = arith.constant 0 : index
    %c0_7 = arith.constant 0 : index
    %8 = vector.load %arg5[%c0_6, %c0_7] : memref<16x128xf32, #tpu.memory_space<vmem>>, vector<16x128xf32>
    tpu.vector_store %arg5[%c0_6, %c0_7], %7 {strides = array<i32>} : memref<16x128xf32, #tpu.memory_space<vmem>>, vector<16x128xf32>,
    return
  }
  func.func @transform_0(%arg0: i32, %arg1: i32, %arg2: i32) -> (i32, i32) {
    %c0_i32 = arith.constant 0 : i32
    return %arg0, %arg2 : i32, i32
  }
  func.func @transform_1(%arg0: i32, %arg1: i32, %arg2: i32) -> (i32, i32) {
    %c0_i32 = arith.constant 0 : i32
    return %arg2, %arg1 : i32, i32
  }
  func.func @transform_2(%arg0: i32, %arg1: i32, %arg2: i32) -> (i32, i32) {
    %c0_i32 = arith.constant 0 : i32
    return %arg0, %arg1 : i32, i32
  }
}

</mosaic_0001>

<bundles_post_ra>
// kernel: tpu_custom_call.1
= control target key start
LH: loop header
LB: loop body
LE: loop exit
PB: predicated region body
PF: predicated region fallthrough
CT: control target
= control target key end

     0   :  { %7 = vsyncpa [#allocation3], 0  ;;  %s372_s0 = inlined_call_operand.hbm [shape: bf16[16,128], index: 0, kind: input, shape index: {}]   ;;  %s373_s1 = inlined_call_operand.hbm [shape: bf16[128,128], index: 1, kind: input, shape index: {}]   ;;  %s374_s2 = inlined_call_operand.hbm [shape: f32[16,128], index: 2, kind: output, shape index: {}]  }
   0x1   :  { %8 = vsyncpa [#allocation6], 0 }
   0x2   :  { %9 = vsyncpa [#allocation4], 0  ;;  %s312_s9 = smov [#allocation2]   ;;  %s240_s13 = scalar_lea.hbm %s372_s0, 128 }
   0x3   :  { %s15_s10 = sshll.u32 %s312_s9, 4  ;;  %p241_p0 = scmp.ne.s32.totalorder %s372_s0, %s240_s13  ;;  %s16_s10 = int_to_ptr.vmem [resolvable:$true] %s15_s10 }
   0x4   :  { %p244_p1 = scmp.lt.u32.totalorder %s240_s13, %s372_s0 }
   0x6   :  { %p246_p2 = pnand %p244_p1, %p241_p0 }
   0x8   :  { %249 = shalt.err (!%p246_p2)
}
   0x9   :  { %s250_s18 = scalar_lea.vmem %s16_s10, 128  ;;  %p255_p4 = scmp.lt.s32.totalorder %s16_s10, %s16_s10 }
   0xa   :  { %p251_p3 = scmp.ne.s32.totalorder %s16_s10, %s250_s18  ;;  %p256_p5 = scmp.lt.s32.totalorder %s250_s18, %s250_s18 }
   0xc   :  { %p257_p6 = por %p256_p5, %p255_p4 }
   0xe   :  { %p258_p7 = pnand %p257_p6, %p251_p3 }
  0x10   :  { %261 = shalt.err (!%p258_p7)
}
  0x11   :  { %s313_s19 = smov 64   ;;  %s314_s20 = smov 4  }
  0x12   :  { %21 = dma.hbm_to_vmem [thread:$0]  %s372_s0, 128, %s16_s10, [#allocation3], %s313_s19, %s313_s19, %s314_s20  }
  0x13   :  { %s315_s23 = smov [#allocation5]   ;;  %s262_s27 = scalar_lea.hbm %s373_s1, 1024 }
  0x14   :  { %s27_s24 = sshll.u32 %s315_s23, 4  ;;  %p263_p8 = scmp.ne.s32.totalorder %s373_s1, %s262_s27  ;;  %s28_s24 = int_to_ptr.vmem [resolvable:$true] %s27_s24 }
  0x15   :  { %p266_p9 = scmp.lt.u32.totalorder %s262_s27, %s373_s1 }
  0x17   :  { %p268_p10 = pnand %p266_p9, %p263_p8 }
  0x19   :  { %271 = shalt.err (!%p268_p10)
}
  0x1a   :  { %s272_s4 = scalar_lea.vmem %s28_s24, 1024  ;;  %p277_p12 = scmp.lt.s32.totalorder %s28_s24, %s28_s24 }
  0x1b   :  { %p273_p11 = scmp.ne.s32.totalorder %s28_s24, %s272_s4  ;;  %p278_p13 = scmp.lt.s32.totalorder %s272_s4, %s272_s4 }
  0x1d   :  { %p279_p0 = por %p278_p13, %p277_p12 }
  0x1f   :  { %p280_p1 = pnand %p279_p0, %p273_p11 }
  0x21   :  { %283 = shalt.err (!%p280_p1)
}
  0x22   :  { %33 = dma.hbm_to_vmem [thread:$0]  %s373_s1, 1024, %s28_s24, [#allocation6], %s313_s19, %s313_s19, %s314_s20  }
  0x23   :  { %306 = dma.done.wait [#allocation3], 128  }
  0x24   :  { %307 = vsyncadd [#allocation3], 4294967168 }
  0x25   :  { %308 = dma.done.wait [#allocation6], 1024  }
  0x26   :  { %309 = vsyncadd [#allocation6], 4294966272  ;;  %v316_v0 = vmov 0.0   ;;  %vm317_vm0 = vmmov 0   ;;  %v231_v1 = vld [vmem:[#allocation5] sm:$0xff]   ;;  %v232_v2 = vld [vmem:[#allocation5 + $0x8] sm:$0xff]  }
  0x27   :  { %202 = vmatprep.subr.bf16.mxu0 %v316_v0  ;;  %218 = vmatprep.mubr.msk.bf16.mxu0 %vm317_vm0, %v316_v0  ;;  %v233_v3 = vld [vmem:[#allocation5 + $0x10] sm:$0xff]   ;;  %v234_v4 = vld [vmem:[#allocation5 + $0x18] sm:$0xff]   ;;  %v235_v5 = vld [vmem:[#allocation5 + $0x20] sm:$0xff]   ;;  %s318_s1 = smov [#allocation7]  }
  0x28   :  { %203 = vmatpush3.bf16.msra.mxu0 %v231_v1  ;;  %v236_v6 = vld [vmem:[#allocation5 + $0x28] sm:$0xff]   ;;  %v237_v7 = vld [vmem:[#allocation5 + $0x30] sm:$0xff]   ;;  %v238_v8 = vld [vmem:[#allocation5 + $0x38] sm:$0xff]   ;;  %s171_s6 = sshll.u32 %s318_s1, 4  ;;  %s172_s6 = int_to_ptr.vmem [resolvable:$true] %s171_s6 }
  0x29   :  { %204 = vmatprep.subr.bf16.mxu0 %v316_v0  ;;  %v239_v9 = vld [vmem:[#allocation2] sm:$0xff]   ;;  %s284_s7 = scalar_lea.vmem %s172_s6, 256  ;;  %p289_p3 = scmp.lt.s32.totalorder %s172_s6, %s172_s6 }
  0x2a   :  { %p285_p2 = scmp.ne.s32.totalorder %s172_s6, %s284_s7  ;;  %p290_p4 = scmp.lt.s32.totalorder %s284_s7, %s284_s7 }
  0x2c   :  { %205 = vmatpush3.bf16.msra.mxu0 %v232_v2  ;;  %p291_p5 = por %p290_p4, %p289_p3 }
  0x2d   :  { %206 = vmatprep.subr.bf16.mxu0 %v316_v0 }
  0x2e   :  { %p292_p6 = pnand %p291_p5, %p285_p2 }
  0x30   :  { %207 = vmatpush3.bf16.msra.mxu0 %v233_v3 }
  0x31   :  { %208 = vmatprep.subr.bf16.mxu0 %v316_v0 }
  0x34   :  { %209 = vmatpush3.bf16.msra.mxu0 %v234_v4 }
  0x35   :  { %210 = vmatprep.subr.bf16.mxu0 %v316_v0 }
  0x38   :  { %211 = vmatpush3.bf16.msra.mxu0 %v235_v5 }
  0x39   :  { %212 = vmatprep.subr.bf16.mxu0 %v316_v0 }
  0x3c   :  { %213 = vmatpush3.bf16.msra.mxu0 %v236_v6 }
  0x3d   :  { %214 = vmatprep.subr.bf16.mxu0 %v316_v0 }
  0x40   :  { %215 = vmatpush3.bf16.msra.mxu0 %v237_v7 }
  0x41   :  { %216 = vmatprep.subr.bf16.mxu0 %v316_v0 }
  0x44   :  { %217 = vmatpush3.bf16.msra.mxu0 %v238_v8 }
  0x47   :  { %219 = vmatmul.mubr.bf16.vlgmr.msra.gmra.mrb[0].mxu0 %v239_v9 }
 0x11a   :  { %v155_v10 = vpop.f32.mrb[0].mxu0 }
 0x11b   :  { %v220_v11 = vpop.f32.mrb[1].mxu0  ;;  %164 = vst [vmem:[#allocation7] sm:$0xff] %v155_v10 }
 0x11c   :  { %v158_v12 = vpop.f32.mrb[2].mxu0 }
 0x11d   :  { %v221_v13 = vpop.f32.mrb[3].mxu0  ;;  %165 = vst [vmem:[#allocation7 + $0x8] sm:$0xff] %v158_v12 }
 0x11e   :  { %295 = shalt.err (!%p292_p6)
}
 0x11f   :  { %s296_s10 = scalar_lea.hbm %s374_s2, 256 }
 0x120   :  { %p297_p7 = scmp.ne.s32.totalorder %s374_s2, %s296_s10  ;;  %p300_p8 = scmp.lt.u32.totalorder %s296_s10, %s374_s2 }
 0x122   :  { %p302_p9 = pnand %p300_p8, %p297_p7 }
 0x124   :  { %305 = shalt.err (!%p302_p9)
}
 0x125   :  { %s319_s15 = smov 128   ;;  %s320_s16 = smov 8  }
 0x126   :  { %177 = dma.vmem_to_hbm [thread:$0]  %s172_s6, 256, %s374_s2, [#allocation4], %s319_s15, %s319_s15, %s320_s16  }
 0x127   :  { %310 = dma.done.wait [#allocation4], 256  }
 0x128   :  { %311 = vsyncadd [#allocation4], 4294967040 }
 0x129   :  { %181 = vsyncpa [#allocation3], 1 }
 0x12a   :  { %182 = vsyncpa [#allocation6], 1 }
 0x12b   :  { %183 = vsyncpa [#allocation4], 1 }

</bundles_post_ra>
